<compile_context>
chip_gen: v7x
topology: tpu7x:2x2x1
jax: 0.10.0
libtpu: 0.0.40
codegen_flags: <defaults>
</compile_context>

<pallas_src>
import jax
import jax.numpy as jnp
from jax import lax
from jax.experimental import pallas as pl
from jax.experimental.pallas import tpu as pltpu


_INV_SQRT2 = 0.7071067811865476  # 1 / sqrt(2)


def _gelu_exact(g):
    # Exact (erf) GELU, matching torch.nn.GELU() default.
    return 0.5 * g * (1.0 + lax.erf(g * _INV_SQRT2))


def _geglu_kernel(x_ref, wv_ref, wg_ref, bv_ref, bg_ref, o_ref, acc_v, acc_g):
    """Multi-K-step kernel: f32 accumulators resident in VMEM across K steps."""
    k = pl.program_id(2)

    x = x_ref[...]
    dv = jnp.dot(x, wv_ref[...], preferred_element_type=jnp.float32)
    dg = jnp.dot(x, wg_ref[...], preferred_element_type=jnp.float32)

    # First K step writes straight into the accumulators: saves a full
    # (tm, tn) f32 zero-store + reload per accumulator per output tile.
    @pl.when(k == 0)
    def _():
        acc_v[...] = dv
        acc_g[...] = dg

    @pl.when(k > 0)
    def _():
        acc_v[...] += dv
        acc_g[...] += dg

    # Epilogue once, on the last K step: bias, exact GELU on gate, product.
    @pl.when(k == pl.num_programs(2) - 1)
    def _():
        val = acc_v[...] + bv_ref[...].astype(jnp.float32)
        gate = acc_g[...] + bg_ref[...].astype(jnp.float32)
        o_ref[...] = (val * _gelu_exact(gate)).astype(o_ref.dtype)


def _geglu_kernel_single_k(x_ref, wv_ref, wg_ref, bv_ref, bg_ref, o_ref):
    """Single-K-step kernel: no scratch accumulators, everything fused."""
    x = x_ref[...]
    val = jnp.dot(x, wv_ref[...], preferred_element_type=jnp.float32)
    gate = jnp.dot(x, wg_ref[...], preferred_element_type=jnp.float32)
    val = val + bv_ref[...].astype(jnp.float32)
    gate = gate + bg_ref[...].astype(jnp.float32)
    o_ref[...] = (val * _gelu_exact(gate)).astype(o_ref.dtype)


# ----------------------------- tiling helpers ------------------------------ #

def _cdiv(a, b):
    return -(-a // b)


def _round_up(a, b):
    return _cdiv(a, b) * b


def _fit_tile(dim_aligned, align, max_tile):
    """Largest tile <= max_tile (aligned) minimizing padding of dim_aligned."""
    max_tile = max(align, _round_up(min(max_tile, dim_aligned), align))
    best_tile = max_tile
    best_pad = _cdiv(dim_aligned, max_tile) * max_tile - dim_aligned
    tile = max_tile
    while tile > align and best_pad > 0:
        tile -= align
        pad = _cdiv(dim_aligned, tile) * tile - dim_aligned
        if pad < best_pad:  # only shrink the tile if it strictly reduces waste
            best_tile, best_pad = tile, pad
    return best_tile, _cdiv(dim_aligned, best_tile) * best_tile


def _vmem_capacity_bytes():
    try:
        return int(pltpu.get_tpu_info().vmem_capacity_bytes)
    except Exception:
        return 64 << 20  # conservative fallback (v7x has 64 MiB per TC)


def _vmem_footprint(tm, tn, tk, itemsize, with_acc=True):
    foot = 2 * (tm * tk + 2 * tk * tn + 2 * tn) * itemsize  # double-buffered in
    foot += 2 * tm * tn * itemsize                          # double-buffered out
    if with_acc:
        foot += 2 * tm * tn * 4                             # two f32 accumulators
    return foot


def _select_tiles(m, n, k, itemsize, tm_max, tn_max, tk_max):
    # dtype-native sublane multiple: f32 -> 8, bf16 -> 16, int8/fp8 -> 32.
    sub = {4: 8, 2: 16, 1: 32}.get(itemsize, 8)
    m_al = _round_up(m, sub)
    n_al = _round_up(n, 128)
    k_al = _round_up(k, 128)

    # Megacore / v7x dual-TC: ensure at least one "parallel" axis has >= 2
    # tiles so the grid can be sharded across TensorCores.
    if _cdiv(m_al, tm_max) < 2 and _cdiv(n_al, tn_max) < 2:
        if n_al >= 256:
            tn_max = _round_up(_cdiv(n_al, 2), 128)
        elif m_al >= 2 * sub:
            tm_max = _round_up(_cdiv(m_al, 2), sub)

    tm, m_pad = _fit_tile(m_al, sub, tm_max)
    tn, n_pad = _fit_tile(n_al, 128, tn_max)
    tk, k_pad = _fit_tile(k_al, 128, tk_max)

    # VMEM-aware shrink (matters mostly for f32 operands on v7x's 64 MiB VMEM).
    budget = int(0.75 * _vmem_capacity_bytes())
    for _ in range(16):
        if _vmem_footprint(tm, tn, tk, itemsize) <= budget:
            break
        if tk >= max(tm, tn) and tk > 128:
            tk, k_pad = _fit_tile(k_al, 128, max(128, tk // 2))
        elif tm >= tn and tm > sub:
            tm, m_pad = _fit_tile(m_al, sub, max(sub, tm // 2))
        elif tn > 128:
            tn, n_pad = _fit_tile(n_al, 128, max(128, tn // 2))
        else:
            break
    return tm, tn, tk, m_pad, n_pad, k_pad


# --------------------------------- wrapper --------------------------------- #

def geglu(x, weight, bias, *, tm_max=1024, tn_max=512, tk_max=1024):
    """GeGLU forward.

    x      : (batch, seq, in_channels)
    weight : (in_channels, 2*out_channels)
    bias   : (2*out_channels,)
    returns: (batch, seq, out_channels)
    """
    batch, seq, in_ch = x.shape
    two_n = weight.shape[1]
    n_out = two_n // 2
    m = batch * seq
    itemsize = jnp.dtype(x.dtype).itemsize

    tm, tn, tk, m_pad, n_pad, k_pad = _select_tiles(
        m, n_out, in_ch, itemsize, tm_max, tn_max, tk_max)

    # Flatten rows; zero-pad only if needed (padded rows/cols sliced off below,
    # zero-padded K contributes nothing to the reduction).
    x2d = x.reshape(m, in_ch)
    if (m_pad, k_pad) != (m, in_ch):
        x2d = jnp.pad(x2d, ((0, m_pad - m), (0, k_pad - in_ch)))

    n_blocks = n_pad // tn
    if k_pad == in_ch and n_pad == n_out:
        # Fast path: no re-materialization of the (K, 2N) weight. Both val and
        # gate projections read the original array; the gate index_map is
        # offset by n_blocks blocks along the lane axis. Same for the bias.
        w_val = w_gate = weight
        b2d = bias.reshape(1, two_n)
        b_val = b_gate = b2d
        gate_off = n_blocks
    else:
        # Fallback for unaligned channel counts: split + zero-pad.
        # TODO(synk): hoist this split/pad to module init for repeated calls.
        w_val = jnp.pad(weight[:, :n_out],
                        ((0, k_pad - in_ch), (0, n_pad - n_out)))
        w_gate = jnp.pad(weight[:, n_out:],
                         ((0, k_pad - in_ch), (0, n_pad - n_out)))
        b_val = jnp.pad(bias[:n_out].reshape(1, n_out),
                        ((0, 0), (0, n_pad - n_out)))
        b_gate = jnp.pad(bias[n_out:].reshape(1, n_out),
                         ((0, 0), (0, n_pad - n_out)))
        gate_off = 0

    k_tiles = k_pad // tk
    grid = (m_pad // tm, n_blocks, k_tiles)

    in_specs = [
        pl.BlockSpec((tm, tk), lambda i, j, k: (i, k)),                  # x
        pl.BlockSpec((tk, tn), lambda i, j, k: (k, j)),                  # w_val
        pl.BlockSpec((tk, tn), lambda i, j, k, o=gate_off: (k, j + o)),  # w_gate
        pl.BlockSpec((1, tn), lambda i, j, k: (0, j)),                   # b_val
        pl.BlockSpec((1, tn), lambda i, j, k, o=gate_off: (0, j + o)),   # b_gate
    ]
    out_spec = pl.BlockSpec((tm, tn), lambda i, j, k: (i, j))

    if k_tiles == 1:
        kernel = _geglu_kernel_single_k
        scratch = []
    else:
        kernel = _geglu_kernel
        scratch = [pltpu.VMEM((tm, tn), jnp.float32),   # value accumulator
                   pltpu.VMEM((tm, tn), jnp.float32)]   # gate accumulator

    foot = _vmem_footprint(tm, tn, tk, itemsize, with_acc=(k_tiles > 1))
    vmem_limit = int(min(_vmem_capacity_bytes(),
                         max(32 << 20, foot * 5 // 4 + (4 << 20))))

    out2d = pl.pallas_call(
        kernel,
        out_shape=jax.ShapeDtypeStruct((m_pad, n_pad), x.dtype),
        grid_spec=pltpu.PrefetchScalarGridSpec(
            num_scalar_prefetch=0,
            grid=grid,
            in_specs=in_specs,
            out_specs=out_spec,
            scratch_shapes=scratch,
        ),
        compiler_params=pltpu.CompilerParams(
            dimension_semantics=("parallel", "parallel", "arbitrary"),
            vmem_limit_bytes=vmem_limit,
        ),
    )(x2d, w_val, w_gate, b_val, b_gate)

    if (m_pad, n_pad) != (m, n_out):
        out2d = out2d[:m, :n_out]
    return out2d.reshape(batch, seq, n_out)


def _geglu_ref(x, weight, bias):
    proj = jnp.einsum("bsi,io->bso", x, weight) + bias
    n = proj.shape[-1] // 2
    val, gate = proj[..., :n], proj[..., n:]
    return val * jax.nn.gelu(gate, approximate=False)


def _make_inputs(key, batch, seq, in_channels, out_channels, dtype=jnp.float32):
    k_x, k_w, k_b = jax.random.split(key, 3)
    x = jax.random.normal(k_x, (batch, seq, in_channels), dtype=dtype)
    bound = 1.0 / jnp.sqrt(in_channels)
    weight = jax.random.uniform(
        k_w, (in_channels, 2 * out_channels), minval=-bound, maxval=bound,
        dtype=dtype)
    bias = jax.random.uniform(
        k_b, (2 * out_channels,), minval=-bound, maxval=bound, dtype=dtype)
    return x, weight, bias


if __name__ == "__main__":
    key = jax.random.PRNGKey(0)
    k1, k2 = jax.random.split(key)

    # Test 1: tiny shape (single K step, scratch-free kernel, fallback pad path).
    batch, seq, in_channels, out_channels = 2, 8, 32, 32
    x, weight, bias = _make_inputs(k1, batch, seq, in_channels, out_channels)
    out = jax.block_until_ready(geglu(x, weight, bias))
    ref = _geglu_ref(x, weight, bias)
    assert out.shape == (batch, seq, out_channels)
    assert jnp.allclose(out, ref, atol=2e-5, rtol=2e-5), "mismatch vs reference (1)"

    # Test 2: small tiles forced so the multi-K accumulator path, the
    # single-weight fast path, and multi-tile parallel axes are exercised.
    batch, seq, in_channels, out_channels = 2, 16, 256, 128
    x, weight, bias = _make_inputs(k2, batch, seq, in_channels, out_channels)
    out = jax.block_until_ready(
        geglu(x, weight, bias, tm_max=16, tn_max=128, tk_max=128))
    ref = _geglu_ref(x, weight, bias)
    assert out.shape == (batch, seq, out_channels)
    assert jnp.allclose(out, ref, atol=1e-4, rtol=1e-4), "mismatch vs reference (2)"

    print("KERNEL_OK")
</pallas_src>

<mosaic_0001>
module attributes {stable_mosaic.version = 11 : i64} {
  func.func @_geglu_kernel_single_k(%arg0: i32, %arg1: i32, %arg2: i32, %arg3: memref<8x128xf32, #tpu.memory_space<vmem>>, %arg4: memref<128x128xf32, #tpu.memory_space<vmem>>, %arg5: memref<128x128xf32, #tpu.memory_space<vmem>>, %arg6: memref<1x128xf32, #tpu.memory_space<vmem>>, %arg7: memref<1x128xf32, #tpu.memory_space<vmem>>, %arg8: memref<8x128xf32, #tpu.memory_space<vmem>>) attributes {dimension_semantics = [#tpu.dimension_semantics<parallel>, #tpu.dimension_semantics<parallel>, #tpu.dimension_semantics<arbitrary>], iteration_bounds = array<i64: 2, 1, 1>, scalar_prefetch = 0 : i64, scratch_operands = 0 : i64, tpu.core_type = #tpu.core_type<tc>, window_params = [{transform_indices = @transform_0, window_bounds = array<i64: 8, 128>}, {transform_indices = @transform_1, window_bounds = array<i64: 128, 128>}, {transform_indices = @transform_2, window_bounds = array<i64: 128, 128>}, {transform_indices = @transform_3, window_bounds = array<i64: 1, 128>}, {transform_indices = @transform_4, window_bounds = array<i64: 1, 128>}, {transform_indices = @transform_5, window_bounds = array<i64: 8, 128>}]} {
    %c0 = arith.constant 0 : index
    %c0_0 = arith.constant 0 : index
    %0 = vector.load %arg3[%c0, %c0_0] : memref<8x128xf32, #tpu.memory_space<vmem>>, vector<8x128xf32>
    %c0_1 = arith.constant 0 : index
    %c0_2 = arith.constant 0 : index
    %1 = vector.load %arg4[%c0_1, %c0_2] : memref<128x128xf32, #tpu.memory_space<vmem>>, vector<128x128xf32>
    %cst = arith.constant dense<0.000000e+00> : vector<8x128xf32>
    %2 = tpu.matmul %0, %1, %cst {dimension_numbers = #tpu.dot_dimension_numbers<[1], [0], [0], [1], [0, 0, 1, 1], [], []>} : vector<8x128xf32>, vector<128x128xf32>, vector<8x128xf32> -> vector<8x128xf32>
    %c0_3 = arith.constant 0 : index
    %c0_4 = arith.constant 0 : index
    %3 = vector.load %arg5[%c0_3, %c0_4] : memref<128x128xf32, #tpu.memory_space<vmem>>, vector<128x128xf32>
    %cst_5 = arith.constant dense<0.000000e+00> : vector<8x128xf32>
    %4 = tpu.matmul %0, %3, %cst_5 {dimension_numbers = #tpu.dot_dimension_numbers<[1], [0], [0], [1], [0, 0, 1, 1], [], []>} : vector<8x128xf32>, vector<128x128xf32>, vector<8x128xf32> -> vector<8x128xf32>
    %c0_6 = arith.constant 0 : index
    %c0_7 = arith.constant 0 : index
    %5 = vector.load %arg6[%c0_6, %c0_7] : memref<1x128xf32, #tpu.memory_space<vmem>>, vector<1x128xf32>
    %6 = vector.broadcast %5 : vector<1x128xf32> to vector<8x128xf32>
    %7 = arith.addf %2, %6 : vector<8x128xf32>
    %c0_8 = arith.constant 0 : index
    %c0_9 = arith.constant 0 : index
    %8 = vector.load %arg7[%c0_8, %c0_9] : memref<1x128xf32, #tpu.memory_space<vmem>>, vector<1x128xf32>
    %9 = vector.broadcast %8 : vector<1x128xf32> to vector<8x128xf32>
    %10 = arith.addf %4, %9 : vector<8x128xf32>
    %cst_10 = arith.constant 5.000000e-01 : f32
    %11 = vector.broadcast %cst_10 : f32 to vector<8x128xf32>
    %12 = arith.mulf %11, %10 : vector<8x128xf32>
    %cst_11 = arith.constant 0.707106769 : f32
    %13 = vector.broadcast %cst_11 : f32 to vector<8x128xf32>
    %14 = arith.mulf %10, %13 : vector<8x128xf32>
    %15 = math.erf %14 : vector<8x128xf32>
    %cst_12 = arith.constant 1.000000e+00 : f32
    %16 = vector.broadcast %cst_12 : f32 to vector<8x128xf32>
    %17 = arith.addf %16, %15 : vector<8x128xf32>
    %18 = arith.mulf %12, %17 : vector<8x128xf32>
    %19 = arith.mulf %7, %18 : vector<8x128xf32>
    %c0_13 = arith.constant 0 : index
    %c0_14 = arith.constant 0 : index
    %20 = vector.load %arg8[%c0_13, %c0_14] : memref<8x128xf32, #tpu.memory_space<vmem>>, vector<8x128xf32>
    tpu.vector_store %arg8[%c0_13, %c0_14], %19 {strides = array<i32>} : memref<8x128xf32, #tpu.memory_space<vmem>>, vector<8x128xf32>,
    return
  }
  func.func @transform_0(%arg0: i32, %arg1: i32, %arg2: i32) -> (i32, i32) {
    %c0_i32 = arith.constant 0 : i32
    return %arg0, %arg2 : i32, i32
  }
  func.func @transform_1(%arg0: i32, %arg1: i32, %arg2: i32) -> (i32, i32) {
    %c0_i32 = arith.constant 0 : i32
    return %arg2, %arg1 : i32, i32
  }
  func.func @transform_2(%arg0: i32, %arg1: i32, %arg2: i32) -> (i32, i32) {
    %c0_i32 = arith.constant 0 : i32
    %0 = arith.addi %arg1, %c0_i32 : i32
    %c0_i32_0 = arith.constant 0 : i32
    return %arg2, %0 : i32, i32
  }
  func.func @transform_3(%arg0: i32, %arg1: i32, %arg2: i32) -> (i32, i32) {
    %c0_i32 = arith.constant 0 : i32
    %c0_i32_0 = arith.constant 0 : i32
    return %c0_i32, %arg1 : i32, i32
  }
  func.func @transform_4(%arg0: i32, %arg1: i32, %arg2: i32) -> (i32, i32) {
    %c0_i32 = arith.constant 0 : i32
    %0 = arith.addi %arg1, %c0_i32 : i32
    %c0_i32_0 = arith.constant 0 : i32
    %c0_i32_1 = arith.constant 0 : i32
    return %c0_i32_0, %0 : i32, i32
  }
  func.func @transform_5(%arg0: i32, %arg1: i32, %arg2: i32) -> (i32, i32) {
    %c0_i32 = arith.constant 0 : i32
    return %arg0, %arg1 : i32, i32
  }
}

</mosaic_0001>

<bundles_post_ra>
// kernel: tpu_custom_call.1
= control target key start
LH: loop header
LB: loop body
LE: loop exit
PB: predicated region body
PF: predicated region fallthrough
CT: control target
= control target key end

     0   :  { %10 = vsyncpa [#allocation3], 0  ;;  %s1443_s0 = inlined_call_operand.hbm [shape: f32[16,128], index: 0, kind: input, shape index: {}]   ;;  %s1444_s1 = inlined_call_operand.hbm [shape: f32[128,128], index: 1, kind: input, shape index: {}]   ;;  %s1445_s2 = inlined_call_operand.hbm [shape: f32[128,128], index: 2, kind: input, shape index: {}]   ;;  %s1446_s3 = inlined_call_operand.vmem [shape: f32[1,128], index: 3, kind: input, shape index: {}]   ;;  %s1447_s4 = inlined_call_operand.vmem [shape: f32[1,128], index: 4, kind: input, shape index: {}]   ;;  %s1448_s5 = inlined_call_operand.hbm [shape: f32[16,128], index: 5, kind: output, shape index: {}]  }
   0x1   :  { %12 = vsyncpa [#allocation3 + $0x1], 0 }
   0x2   :  { %13 = vsyncpa [#allocation6], 0 }
   0x3   :  { %14 = vsyncpa [#allocation4], 0 }
   0x4   :  { %16 = vsyncpa [#allocation4 + $0x1], 0  ;;  %s1164_s18 = smov 0   ;;  %s1166_s19 = smov 0  }
   0x5   :  { %s1168_s20 = smov 0   ;;  %s1170_s21 = smov 0  }
   0x6   :  { %s1172_s22 = smov 0   ;;  %s1174_s23 = smov 0  }
   0x7 LB: > { %s688_s24 = sadd.s32 4294967295, %s1123_s23   ;;  %s689_s25 = sadd.s32 4294967294, %s1123_s23   ;;  %s1123_s23 = sphi %s1174_s23, %s22_s23   ;;  %s1119_s22 = sphi %s1172_s22, %s1470_s22   ;;  %s1115_s21 = sphi %s1170_s21, %s1469_s21   ;;  %s1111_s20 = sphi %s1168_s20, %s1468_s20   ;;  %s1107_s19 = sphi %s1166_s19, %s1467_s19   ;;  %s1103_s18 = sphi %s1164_s18, %s1466_s18  }
   0x8   : > { %p63_p0 = scmp.ne.s32.totalorder %s1107_s19, %s1103_s18  ;;  %p1198_p1 = scmp.eq.s32.totalorder %s688_s24, 0 }
   0x9   : > { %p1202_p2 = scmp.eq.s32.totalorder %s688_s24, 1  ;;  %p203_p3 = scmp.eq.s32.totalorder %s689_s25, 1 }
   0xa   : > { %s1453_s26 = scalar_select %p1198_p1, 1, 0 }
   0xb   : > { %p1208_p4 = por %p1198_p1, %p63_p0  ;;  %p690_p5 = scmp.ge.s32.totalorder %s1123_s23, 1 }
   0xc   : > { %p1213_p6 = por %p203_p3, %p63_p0  ;;  %p210_p7 = scmp.lt.s32.totalorder %s1123_s23, 3 }
   0xd   : > { %s1455_s28 = scalar_select %p1208_p4, 1, 0 }
   0xe   : > { %s1456_s29 = scalar_select %p1213_p6, 1, 0 }
   0xf   : > { %p1218_p8 = pnand %p690_p5, %p210_p7  ;;  %s1125_s6 = smov [#allocation5]  }
  0x10   : > { %s226_s7 = sshll.u32 %s1125_s6, 4  ;;  %s1126_s9 = smov [#allocation7]   ;;  %s1222_s7 = int_to_ptr.vmem [resolvable:$true] %s226_s7 }
  0x11   : > { %p873_p9 = pneg %p1218_p8  ;;  %s243_s10 = sshll.u32 %s1126_s9, 4  ;;  %s1233_s10 = int_to_ptr.vmem [resolvable:$true] %s243_s10 }
  0x12   : > { %s951_s13 = scalar_lea.hbm %s1444_s1, 2048 }
  0x13   : > { %p1229_p11 = pnand %p873_p9, %p1198_p1  ;;  %p952_p12 = scmp.ne.s32.totalorder %s1444_s1, %s951_s13 }
  0x14   : > { %p958_p5 = scmp.lt.u32.totalorder %s951_s13, %s1444_s1 }
  0x15   : > { %p953_p13 = pneg %p1229_p11 }
  0x17   : > { %p954_p0 = pnand %p953_p13, %p952_p12 }
  0x19   : > { %p955_p3 = pneg %p954_p0 }
  0x1b   : > { %p960_p7 = pnand %p958_p5, %p955_p3 }
  0x1d   : > { %963 = shalt.err (!%p960_p7)
}
  0x1e   : > { %s964_s24 = scalar_lea.vmem %s1222_s7, 2048  ;;  %p972_p1 = scmp.lt.s32.totalorder %s1222_s7, %s1222_s7 }
  0x1f   : > { %p965_p9 = scmp.ne.s32.totalorder %s1222_s7, %s964_s24  ;;  %p973_p12 = scmp.lt.s32.totalorder %s964_s24, %s964_s24 }
  0x21   : > { %p967_p10 = pnand %p965_p9, %p953_p13  ;;  %p974_p0 = por %p973_p12, %p972_p1 }
  0x23   : > { %p968_p6 = pneg %p967_p10 }
  0x25   : > { %p975_p4 = pnand %p974_p0, %p968_p6 }
  0x27   : > { %978 = shalt.err (!%p975_p4)
}
  0x28   : > { %s1127_s25 = smov 128   ;;  %s1128_s6 = smov 8  }
  0x29   : > { %876 = dma.hbm_to_vmem [thread:$0]  (!%p1229_p11), %s1444_s1, 2048, %s1222_s7, [#allocation6], %s1127_s25, %s1127_s25, %s1128_s6  }
  0x2a   : > { %s979_s14 = scalar_lea.hbm %s1445_s2, 2048 }
  0x2b   : > { %p980_p1 = scmp.ne.s32.totalorder %s1445_s2, %s979_s14  ;;  %p986_p10 = scmp.lt.u32.totalorder %s979_s14, %s1445_s2 }
  0x2d   : > { %p982_p4 = pnand %p980_p1, %p953_p13 }
  0x2f   : > { %p983_p6 = pneg %p982_p4 }
  0x31   : > { %p988_p3 = pnand %p986_p10, %p983_p6 }
  0x33   : > { %991 = shalt.err (!%p988_p3)
}
  0x34   : > { %s992_s7 = scalar_lea.vmem %s1233_s10, 2048  ;;  %p1000_p12 = scmp.lt.s32.totalorder %s1233_s10, %s1233_s10 }
  0x35   : > { %p993_p5 = scmp.ne.s32.totalorder %s1233_s10, %s992_s7  ;;  %p1001_p0 = scmp.lt.s32.totalorder %s992_s7, %s992_s7 }
  0x37   : > { %p995_p7 = pnand %p993_p5, %p953_p13  ;;  %p1002_p1 = por %p1001_p0, %p1000_p12 }
  0x39   : > { %p996_p9 = pneg %p995_p7 }
  0x3b   : > { %p1003_p4 = pnand %p1002_p1, %p996_p9 }
  0x3d   : > { %1006 = shalt.err (!%p1003_p4)
}
  0x3e   : > { %879 = dma.hbm_to_vmem [thread:$0]  (!%p1229_p11), %s1445_s2, 2048, %s1233_s10, [#allocation6], %s1127_s25, %s1127_s25, %s1128_s6  }
  0x3f   : > { %s41_s12 = sadd.s32 1, %s1119_s22  ;;  %s50_s13 = sadd.s32 1, %s1111_s20 }
  0x40   : > { %p43_p13 = scmp.ge.s32.totalorder %s41_s12, 2  ;;  %p57_p6 = scmp.ne.s32.totalorder %s1111_s20, %s1107_s19 }
  0x41   : > { %p58_p10 = scmp.eq.s32.totalorder %s1123_s23, 0  ;;  %p890_p3 = scmp.lt.s32.totalorder %s1123_s23, 2 }
  0x42   : > { %s1472_s12 = smov (%p43_p13, %s41_s12), 0  ;;  %p1297_p7 = por %p1202_p2, %p57_p6 }
  0x43   : > { %p59_p5 = por %p58_p10, %p57_p6  ;;  %s45_s14 = ssub.s32 %s1119_s22, %s1472_s12 }
  0x44   : > { %s1459_s8 = scalar_select %p1297_p7, 1, 0 }
  0x45   : > { %s269_s15 = sand.u32 1, %s1111_s20   ;;  %p48_p9 = scmp.eq.s32.totalorder %s45_s14, 0 }
  0x46   : > { %s696_s10 = sshll.u32 %s269_s15, 3  ;;  %s697_s25 = sshll.u32 %s1119_s22, 7 }
  0x47   : > { %s1306_s6 = scalar_select %p48_p9, %s1111_s20, %s50_s13  }
  0x48   : > { %s1311_s24 = scalar_lea.hbm %s1443_s0, %s697_s25  ;;  %s273_s27 = scalar_lea.vmem [#allocation2], %s696_s10 }
  0x49   : > { %s281_s7 = sshll.u32 %s273_s27, 4  ;;  %p1315_p2 = pnand %p890_p3, %p59_p5  ;;  %s1319_s7 = int_to_ptr.vmem [resolvable:$true] %s281_s7 }
  0x4a   : > { %s270_s11 = scalar_lea.sflag [#allocation3], %s269_s15  ;;  %s1007_s13 = scalar_lea.hbm %s1311_s24, 128 }
  0x4b   : > { %p1008_p11 = scmp.ne.s32.totalorder %s1311_s24, %s1007_s13  ;;  %p1009_p12 = pneg %p1315_p2 }
  0x4c   : > { %s1012_s25 = scalar_lea.hbm %s1443_s0, 256  ;;  %p1013_p4 = scmp.lt.u32.totalorder %s1311_s24, %s1443_s0 }
  0x4d   : > { %p1010_p0 = pnand %p1009_p12, %p1008_p11  ;;  %p1014_p13 = scmp.lt.u32.totalorder %s1012_s25, %s1007_s13 }
  0x4e   : > { %p1016_p10 = scmp.lt.u32.totalorder %s1007_s13, %s1311_s24 }
  0x4f   : > { %p1011_p1 = pneg %p1010_p0  ;;  %p1015_p6 = por %p1014_p13, %p1013_p4 }
  0x51   : > { %p1017_p3 = por %p1016_p10, %p1015_p6 }
  0x53   : > { %p1018_p5 = pnand %p1017_p3, %p1011_p1 }
  0x55   : > { %1021 = shalt.err (!%p1018_p5)
}
  0x56   : > { %s1022_s15 = scalar_lea.vmem %s1319_s7, 128  ;;  %s1129_s27 = smov [#allocation2]  }
  0x57   : > { %p1023_p9 = scmp.ne.s32.totalorder %s1319_s7, %s1022_s15  ;;  %s1027_s14 = sshll.u32 %s1129_s27, 4  ;;  %s1028_s14 = int_to_ptr.vmem [resolvable:$false] %s1027_s14 }
  0x58   : > { %s1029_s10 = scalar_lea.vmem %s1028_s14, 256  ;;  %p1030_p7 = scmp.lt.s32.totalorder %s1319_s7, %s1028_s14 }
  0x59   : > { %p1025_p11 = pnand %p1023_p9, %p1009_p12  ;;  %p1031_p4 = scmp.lt.s32.totalorder %s1029_s10, %s1022_s15 }
  0x5b   : > { %p1026_p0 = pneg %p1025_p11  ;;  %p1032_p13 = por %p1031_p4, %p1030_p7 }
  0x5d   : > { %p1033_p6 = pnand %p1032_p13, %p1026_p0 }
  0x5f   : > { %1036 = shalt.err (!%p1033_p6)
}
  0x60   : > { %883 = dma.hbm_to_vmem [thread:$0]  (!%p1315_p2), %s1311_s24, 128, %s1319_s7, %s270_s11  }
  0x61   : > { %290 = sbr.rel (%p1218_p8) target bundleno = 390 (0x186), region = 40  ;;  %s1349_s13 = sand.u32 (!%p1218_p8), 1, %s1107_s19  }
  0x62   : > { %s699_s25 = sshll.u32 (!%p1218_p8), %s1349_s13, 3  ;;  %s293_s16 = scalar_lea.sflag (!%p1218_p8), [#allocation3], %s1349_s13 }
  0x63   : > { %s1355_s17 = scalar_lea.vmem (!%p1218_p8), [#allocation2], %s699_s25  ;;  %p1461_p7 = scmp.ne.s32.totalorder (!%p1218_p8), %s1455_s28, 0 }
  0x68   : > { %1090 = dma.done.wait (%p1461_p7), %s293_s16, 128  }
  0x69   : > { %1092 = vsyncadd (%p1461_p7), %s293_s16, 4294967168  ;;  %p1462_p2 = scmp.ne.s32.totalorder %s1453_s26, 0 }
  0x6b   : > { %1094 = dma.done.wait (%p1462_p2), [#allocation6], 4096  }
  0x6c   : > { %1096 = vsyncadd (%p1462_p2), [#allocation6], 4294963200  ;;  %v1130_v0 = vmov 0.0|0.0   ;;  %vm1131_vm0 = vmmov 0   ;;  %v1132_v1 = vmov 0.0   ;;  %v362_v2 = vld [vmem:[#allocation7] sm:$0xff] }
  0x6d   : > { %837 = vmatprep.subr.bf16.mxu1 %v1130_v0  ;;  %813 = vmatprep.subr.bf16.mxu0 %v1130_v0  ;;  %v363_v3 = vld [vmem:[#allocation7 + $0x8] sm:$0xff]  ;;  %v364_v4 = vld [vmem:[#allocation7 + $0x10] sm:$0xff]  ;;  %v365_v6 = vld [vmem:[#allocation7 + $0x18] sm:$0xff]  ;;  %s706_s7 = sshll.u32 %s1115_s21, 7  ;;  %s336_s9 = scalar_lea.vmem [#allocation8], %s699_s25 }
  0x6e   : > { %810 = vmatprep.mubr.msk.f32.mxu1 %vm1131_vm0, %v1132_v1  ;;  %775 = vmatprep.mubr.msk.f32.mxu0 %vm1131_vm0, %v1132_v1  ;;  %v838_v5 = vpack.c.bf16 %v363_v3, %v362_v2  ;;  %v346_v7 = vld [vmem:[#allocation5] sm:$0xff]  ;;  %v841_v8 = vpack.c.bf16 %v365_v6, %v364_v4  ;;  %v347_v10 = vld [vmem:[#allocation5 + $0x8] sm:$0xff]  ;;  %v348_v13 = vld [vmem:[#allocation5 + $0x10] sm:$0xff]  ;;  %s554_s11 = sshll.u32 %s336_s9, 4  ;;  %s1394_s14 = scalar_lea.hbm %s1448_s5, %s706_s7  ;;  %s1396_s11 = int_to_ptr.vmem [resolvable:$true] %s554_s11 }
  0x6f   : > { %v366_v9 = vld [vmem:[#allocation7 + $0x20] sm:$0xff]  ;;  %v367_v11 = vld [vmem:[#allocation7 + $0x28] sm:$0xff]  ;;  %v814_v12 = vpack.c.bf16 %v347_v10, %v346_v7  ;;  %v349_v14 = vld [vmem:[#allocation5 + $0x18] sm:$0xff]  ;;  %s540_s10 = scalar_lea.sflag [#allocation4], %s1349_s13  ;;  %s1037_s16 = scalar_lea.vmem %s1396_s11, 128 }
  0x70   : > { %839 = vmatpush3.bf16.msra.mxu1 %v838_v5  ;;  %v817_v15 = vpack.c.bf16 %v349_v14, %v348_v13  ;;  %v844_v16 = vpack.c.bf16 %v367_v11, %v366_v9  ;;  %v350_v17 = vld [vmem:[#allocation5 + $0x20] sm:$0xff]  ;;  %v351_v18 = vld [vmem:[#allocation5 + $0x28] sm:$0xff]  ;;  %v368_v19 = vld [vmem:[#allocation7 + $0x30] sm:$0xff]  ;;  %p1038_p8 = scmp.ne.s32.totalorder %s1396_s11, %s1037_s16  ;;  %p1463_p12 = scmp.ne.s32.totalorder %s1459_s8, 0 }
  0x71   : > { %840 = vmatprep.subr.bf16.mxu1 %v1130_v0  ;;  %815 = vmatpush3.bf16.msra.mxu0 %v814_v12  ;;  %v369_v20 = vld [vmem:[#allocation7 + $0x38] sm:$0xff]  ;;  %v820_v21 = vpack.c.bf16 %v351_v18, %v350_v17  ;;  %v352_v23 = vld [vmem:[#allocation5 + $0x30] sm:$0xff]  ;;  %v370_v25 = vld [vmem:[#allocation7 + $0x40] sm:$0xff]  ;;  %s1133_s21 = smov [#allocation8]  }
  0x72   : > { %816 = vmatprep.subr.bf16.mxu0 %v1130_v0  ;;  %v847_v22 = vpack.c.bf16 %v369_v20, %v368_v19  ;;  %v353_v24 = vld [vmem:[#allocation5 + $0x38] sm:$0xff]  ;;  %v371_v26 = vld [vmem:[#allocation7 + $0x48] sm:$0xff]  ;;  %v354_v29 = vld [vmem:[#allocation5 + $0x40] sm:$0xff]  ;;  %p1039_p1 = pnand %p1038_p8, %p1463_p12  ;;  %s1041_s25 = sshll.u32 %s1133_s21, 4  ;;  %s1042_s25 = int_to_ptr.vmem [resolvable:$false] %s1041_s25 }
  0x73   : > { %v823_v27 = vpack.c.bf16 %v353_v24, %v352_v23  ;;  %v850_v28 = vpack.c.bf16 %v371_v26, %v370_v25  ;;  %v355_v30 = vld [vmem:[#allocation5 + $0x48] sm:$0xff]  ;;  %v372_v31 = vld [vmem:[#allocation7 + $0x50] sm:$0xff]  ;;  %v373_v32 = vld [vmem:[#allocation7 + $0x58] sm:$0xff]  ;;  %p1044_p3 = scmp.lt.s32.totalorder %s1396_s11, %s1042_s25 }
  0x74   : > { %842 = vmatpush3.bf16.msra.mxu1 %v841_v8  ;;  %v826_v33 = vpack.c.bf16 %v355_v30, %v354_v29  ;;  %v853_v34 = vpack.c.bf16 %v373_v32, %v372_v31  ;;  %v356_v35 = vld [vmem:[#allocation5 + $0x50] sm:$0xff]  ;;  %v357_v36 = vld [vmem:[#allocation5 + $0x58] sm:$0xff]  ;;  %v374_v37 = vld [vmem:[#allocation7 + $0x60] sm:$0xff]  ;;  %p1040_p10 = pneg %p1039_p1 }
  0x75   : > { %843 = vmatprep.subr.bf16.mxu1 %v1130_v0  ;;  %818 = vmatpush3.bf16.msra.mxu0 %v817_v15  ;;  %v375_v38 = vld [vmem:[#allocation7 + $0x68] sm:$0xff]  ;;  %v829_v39 = vpack.c.bf16 %v357_v36, %v356_v35  ;;  %v358_v41 = vld [vmem:[#allocation5 + $0x60] sm:$0xff]  ;;  %v376_v43 = vld [vmem:[#allocation7 + $0x70] sm:$0xff] }
  0x76   : > { %819 = vmatprep.subr.bf16.mxu0 %v1130_v0  ;;  %v856_v40 = vpack.c.bf16 %v375_v38, %v374_v37  ;;  %v359_v42 = vld [vmem:[#allocation5 + $0x68] sm:$0xff]  ;;  %v377_v44 = vld [vmem:[#allocation7 + $0x78] sm:$0xff]  ;;  %v360_v47 = vld [vmem:[#allocation5 + $0x70] sm:$0xff] }
  0x77   : > { %v832_v45 = vpack.c.bf16 %v359_v42, %v358_v41  ;;  %v859_v46 = vpack.c.bf16 %v377_v44, %v376_v43  ;;  %v361_v48 = vld [vmem:[#allocation5 + $0x78] sm:$0xff]  ;;  %v704_v51 = vld [vmem:[%s1447_s4] ss:$0 sm:$0xff] }
  0x78   : > { %845 = vmatpush3.bf16.msra.mxu1 %v844_v16  ;;  %v835_v49 = vpack.c.bf16 %v361_v48, %v360_v47  ;;  %v345_v50 = vld [vmem:[%s1355_s17] sm:$0xff]  ;;  %s1043_s17 = scalar_lea.vmem %s1042_s25, 256 }
  0x79   : > { %846 = vmatprep.subr.bf16.mxu1 %v1130_v0  ;;  %821 = vmatpush3.bf16.msra.mxu0 %v820_v21  ;;  %v703_v58 = vld [vmem:[%s1446_s3] ss:$0 sm:$0xff]  ;;  %p1045_p5 = scmp.lt.s32.totalorder %s1043_s17, %s1037_s16 }
  0x7a   : > { %822 = vmatprep.subr.bf16.mxu0 %v1130_v0 }
  0x7b   : > { %p1046_p9 = por %p1045_p5, %p1044_p3 }
  0x7c   : > { %848 = vmatpush3.bf16.msra.mxu1 %v847_v22 }
  0x7d   : > { %849 = vmatprep.subr.bf16.mxu1 %v1130_v0  ;;  %824 = vmatpush3.bf16.msra.mxu0 %v823_v27  ;;  %p1047_p11 = pnand %p1046_p9, %p1040_p10 }
  0x7e   : > { %825 = vmatprep.subr.bf16.mxu0 %v1130_v0 }
  0x80   : > { %851 = vmatpush3.bf16.msra.mxu1 %v850_v28 }
  0x81   : > { %852 = vmatprep.subr.bf16.mxu1 %v1130_v0  ;;  %827 = vmatpush3.bf16.msra.mxu0 %v826_v33 }
  0x82   : > { %828 = vmatprep.subr.bf16.mxu0 %v1130_v0 }
  0x84   : > { %854 = vmatpush3.bf16.msra.mxu1 %v853_v34 }
  0x85   : > { %855 = vmatprep.subr.bf16.mxu1 %v1130_v0  ;;  %830 = vmatpush3.bf16.msra.mxu0 %v829_v39 }
  0x86   : > { %831 = vmatprep.subr.bf16.mxu0 %v1130_v0 }
  0x88   : > { %857 = vmatpush3.bf16.msra.mxu1 %v856_v40 }
  0x89   : > { %858 = vmatprep.subr.bf16.mxu1 %v1130_v0  ;;  %833 = vmatpush3.bf16.msra.mxu0 %v832_v45 }
  0x8a   : > { %834 = vmatprep.subr.bf16.mxu0 %v1130_v0 }
  0x8c   : > { %860 = vmatpush3.bf16.msra.mxu1 %v859_v46 }
  0x8d   : > { %836 = vmatpush3.bf16.msra.mxu0 %v835_v49 }
  0x8f   : > { %811 = vmatmul.mubr.f32.vlgmr.msra.gmra.mrb[0].mxu1 %v345_v50 }
  0x90   : > { %776 = vmatmul.mubr.f32.vlgmr.msra.gmra.mrb[0].mxu0 %v345_v50 }
 0x162   : > { %v528_v52 = vpop.f32.mrb[0].mxu1 }
 0x163   : > { %v529_v53 = vadd.f32 %v704_v51, %v528_v52  ;;  %v812_v54 = vpop.f32.mrb[1].mxu1  ;;  %v451_v56 = vpop.f32.mrb[0].mxu0 }
 0x164   : > { %v777_v57 = vpop.f32.mrb[1].mxu0  ;;  %v452_v62 = vadd.f32 %v703_v58, %v451_v56 }
 0x165   : > { %v533_v55 = vmul.f32 0.70710677, %v529_v53  ;;  %v532_v60 = vmul.f32 0.5, %v529_v53 }
 0x167   : > { %949 = verf.f32 %v533_v55 }
 0x171   : > { %v950_v59 = vpop.eup %949 }
 0x172   : > { %v535_v61 = vadd.f32 1.0, %v950_v59 }
 0x174   : > { %v536_v63 = vmul.f32 %v535_v61, %v532_v60 }
 0x176   : > { %v537_v0 = vmul.f32 %v536_v63, %v452_v62 }
 0x178   : > { %538 = vst [vmem:[%s336_s9] sm:$0xff] %v537_v0 }
 0x179   : > { %1050 = shalt.err (!%p1047_p11)
}
 0x17a   : > { %s1051_s13 = scalar_lea.hbm %s1394_s14, 128  ;;  %s1055_s30 = scalar_lea.hbm %s1448_s5, 256 }
 0x17b   : > { %p1052_p0 = scmp.ne.s32.totalorder %s1394_s14, %s1051_s13  ;;  %p1056_p6 = scmp.lt.u32.totalorder %s1394_s14, %s1448_s5 }
 0x17c   : > { %p1057_p7 = scmp.lt.u32.totalorder %s1055_s30, %s1051_s13  ;;  %p1059_p8 = scmp.lt.u32.totalorder %s1051_s13, %s1394_s14 }
 0x17d   : > { %p1053_p4 = pnand %p1052_p0, %p1463_p12 }
 0x17e   : > { %p1058_p2 = por %p1057_p7, %p1056_p6 }
 0x17f   : > { %p1054_p13 = pneg %p1053_p4 }
 0x180   : > { %p1060_p1 = por %p1059_p8, %p1058_p2 }
 0x182   : > { %p1061_p10 = pnand %p1060_p1, %p1054_p13 }
 0x184   : > { %1064 = shalt.err (!%p1061_p10)
}
 0x185   : > { %871 = dma.vmem_to_hbm [thread:$0]  (%p1463_p12), %s1396_s11, 128, %s1394_s14, %s540_s10  }
 0x186 PF: > { %s566_s9 = sand.u32 1, %s1103_s18   ;;  %p1464_p3 = scmp.ne.s32.totalorder %s1456_s29, 0 }
 0x187   : > { %p1465_p5 = scmp.ge.s32.totalorder %s1123_s23, 2  ;;  %s567_s15 = scalar_lea.sflag [#allocation4], %s566_s9 }
 0x189   : > { %p885_p9 = pnand %p1465_p5, %p1464_p3 }
 0x18b   : > { %1098 = dma.done.wait (!%p885_p9), %s567_s15, 128  }
 0x18c   : > { %1100 = vsyncadd (!%p885_p9), %s567_s15, 4294967168  ;;  %s22_s23 = sadd.s32 1, %s1123_s23   ;;  %s1466_s18 = smov %s1107_s19 }
 0x18d   : > { %p19_p11 = scmp.ge.s32.totalorder %s22_s23, 4   ;;  %s1467_s19 = smov %s1111_s20 }
 0x18e   : > { %s1468_s20 = smov %s1306_s6  ;;  %s1469_s21 = smov %s1119_s22 }
 0x18f   : > { %s1470_s22 = smov %s1472_s12  ;;  %21 = sbr.rel (!%p19_p11) target bundleno = 7 (0x7), region = 101 }
 0x196   :  { %572 = vsyncpa [#allocation3], 1 }
 0x197   :  { %574 = vsyncpa [#allocation3 + $0x1], 1 }
 0x198   :  { %575 = vsyncpa [#allocation6], 1 }
 0x199   :  { %576 = vsyncpa [#allocation4], 1 }
 0x19a   :  { %578 = vsyncpa [#allocation4 + $0x1], 1 }

</bundles_post_ra>
